<compile_context>
chip_gen: v7x
topology: tpu7x:2x2x1
jax: 0.10.0
libtpu: 0.0.40
codegen_flags: <defaults>
</compile_context>

<pallas_src>
import functools
import math

import jax
import jax.numpy as jnp
from jax.experimental import pallas as pl
from jax.experimental.pallas import tpu as pltpu

N_PAD = 128          # lane-dense padded width of the final (2-class) layer
NEG_INF = -1e30      # padded-class logit bias -> softmax prob exactly 0


def small_classification_kernel(x_ref, w1_ref, b1_ref, w2_ref, b2_ref, o_ref):
    """Fused: sigmoid(x @ W1 + b1) @ W2 + b2 -> softmax over lanes."""
    # Matmul inputs in bf16 (MXU native), accumulate in f32.
    h = x_ref[...].astype(jnp.bfloat16)
    z1 = jnp.dot(h, w1_ref[...], preferred_element_type=jnp.float32) + b1_ref[...]
    a1 = jax.nn.sigmoid(z1)                                   # f32 elementwise

    z2 = jnp.dot(a1.astype(jnp.bfloat16), w2_ref[...],
                 preferred_element_type=jnp.float32) + b2_ref[...]

    # softmax over the (padded) class axis; padded lanes carry -1e30 bias and
    # zero weight columns, so exp() underflows to exactly 0 for them.
    m = jnp.max(z2, axis=-1, keepdims=True)
    e = jnp.exp(z2 - m)
    o_ref[...] = e / jnp.sum(e, axis=-1, keepdims=True)


def init_params(key, input_size, num_classes=2):
    """Mirror the PyTorch module init.

    Linear weights: xavier_uniform_ (stored transposed, (in, out)).
    Linear biases : torch default U(-1/sqrt(fan_in), 1/sqrt(fan_in)).
    """
    def linear(key, fan_in, fan_out):
        kw, kb = jax.random.split(key)
        limit = math.sqrt(6.0 / (fan_in + fan_out))           # xavier_uniform_
        w = jax.random.uniform(kw, (fan_in, fan_out), jnp.float32, -limit, limit)
        bbound = 1.0 / math.sqrt(fan_in)
        b = jax.random.uniform(kb, (1, fan_out), jnp.float32, -bbound, bbound)
        return w, b

    k1, k2 = jax.random.split(key)
    w1, b1 = linear(k1, input_size, input_size)               # fully_connected
    w2, b2 = linear(k2, input_size, num_classes)              # fully_connected2
    return {"w1": w1, "b1": b1, "w2": w2, "b2": b2}


@functools.partial(jax.jit, static_argnames=("is_training",))
def small_classification_forward(x, params, *, is_training=True):
    del is_training  # forward is identical in train/eval (no dropout / BN)
    B, D = x.shape
    num_classes = params["w2"].shape[1]

    # --- parameter prep (glue): bf16 weights, f32 biases, lane-dense padding.
    w1 = params["w1"].astype(jnp.bfloat16)
    b1 = params["b1"].astype(jnp.float32)
    w2 = jnp.zeros((D, N_PAD), jnp.bfloat16).at[:, :num_classes].set(
        params["w2"].astype(jnp.bfloat16))
    b2 = jnp.full((1, N_PAD), NEG_INF, jnp.float32).at[:, :num_classes].set(
        params["b2"].astype(jnp.float32))

    # --- batch tiling: sublane-aligned tile, weights stay resident across tiles.
    pad8 = pl.cdiv(B, 8) * 8
    tile_b = min(pad8, 128)
    pad_b = pl.cdiv(B, tile_b) * tile_b
    xp = x if pad_b == B else jnp.zeros((pad_b, D), x.dtype).at[:B].set(x)

    out = pl.pallas_call(
        small_classification_kernel,
        out_shape=jax.ShapeDtypeStruct((pad_b, N_PAD), jnp.float32),
        grid=(pad_b // tile_b,),
        in_specs=[
            pl.BlockSpec((tile_b, D), lambda i: (i, 0)),      # x tile per step
            pl.BlockSpec((D, D),      lambda i: (0, 0)),      # W1: VMEM-resident
            pl.BlockSpec((1, D),      lambda i: (0, 0)),      # b1
            pl.BlockSpec((D, N_PAD),  lambda i: (0, 0)),      # W2 (padded, bf16)
            pl.BlockSpec((1, N_PAD),  lambda i: (0, 0)),      # b2 (padded, f32)
        ],
        out_specs=pl.BlockSpec((tile_b, N_PAD), lambda i: (i, 0)),
        compiler_params=pltpu.CompilerParams(
            dimension_semantics=("parallel",),                # megacore / v7x 2-TC
        ),
    )(xp, w1, b1, w2, b2)

    return out[:B, :num_classes]


def reference_forward(x, params):
    """Pure-JAX reference mimicking the kernel's dtype handling."""
    w1 = params["w1"].astype(jnp.bfloat16)
    w2 = params["w2"].astype(jnp.bfloat16)
    z1 = jnp.dot(x.astype(jnp.bfloat16), w1,
                 preferred_element_type=jnp.float32) + params["b1"]
    a1 = jax.nn.sigmoid(z1)
    z2 = jnp.dot(a1.astype(jnp.bfloat16), w2,
                 preferred_element_type=jnp.float32) + params["b2"]
    return jax.nn.softmax(z2, axis=-1)


if __name__ == "__main__":
    key = jax.random.PRNGKey(0)
    key, kx, kp = jax.random.split(key, 3)

    input_size = 64
    batch = 4                       # deliberately not a multiple of 8 -> exercises padding
    x = jax.random.normal(kx, (batch, input_size), jnp.float32)
    params = init_params(kp, input_size)

    out = small_classification_forward(x, params, is_training=True)
    out = jax.block_until_ready(out)

    assert out.shape == (batch, 2) and out.dtype == jnp.float32
    assert bool(jnp.all(jnp.isfinite(out)))
    # softmax rows sum to 1
    assert bool(jnp.allclose(jnp.sum(out, axis=1), 1.0, atol=1e-4))
    # matches the plain-JAX reference (same bf16 matmul-input dtypes)
    ref = reference_forward(x, params)
    assert bool(jnp.allclose(out, ref, atol=1e-4, rtol=1e-3))

    print("KERNEL_OK")
</pallas_src>

<mosaic_0001>
module attributes {stable_mosaic.version = 11 : i64} {
  func.func @small_classification_kernel(%arg0: i32, %arg1: memref<8x64xf32, #tpu.memory_space<vmem>>, %arg2: memref<64x64xbf16, #tpu.memory_space<vmem>>, %arg3: memref<1x64xf32, #tpu.memory_space<vmem>>, %arg4: memref<64x128xbf16, #tpu.memory_space<vmem>>, %arg5: memref<1x128xf32, #tpu.memory_space<vmem>>, %arg6: memref<8x128xf32, #tpu.memory_space<vmem>>) attributes {dimension_semantics = [#tpu.dimension_semantics<parallel>], iteration_bounds = array<i64: 1>, scalar_prefetch = 0 : i64, scratch_operands = 0 : i64, tpu.core_type = #tpu.core_type<tc>, window_params = [{transform_indices = @transform_0, window_bounds = array<i64: 8, 64>}, {pipeline_mode = #tpu.pipeline_mode<synchronous>, transform_indices = @transform_1, window_bounds = array<i64: 64, 64>}, {pipeline_mode = #tpu.pipeline_mode<synchronous>, transform_indices = @transform_2, window_bounds = array<i64: 1, 64>}, {pipeline_mode = #tpu.pipeline_mode<synchronous>, transform_indices = @transform_3, window_bounds = array<i64: 64, 128>}, {pipeline_mode = #tpu.pipeline_mode<synchronous>, transform_indices = @transform_4, window_bounds = array<i64: 1, 128>}, {transform_indices = @transform_5, window_bounds = array<i64: 8, 128>}]} {
    %c0 = arith.constant 0 : index
    %c0_0 = arith.constant 0 : index
    %0 = vector.load %arg1[%c0, %c0_0] : memref<8x64xf32, #tpu.memory_space<vmem>>, vector<8x64xf32>
    %1 = arith.truncf %0 : vector<8x64xf32> to vector<8x64xbf16>
    %c0_1 = arith.constant 0 : index
    %c0_2 = arith.constant 0 : index
    %2 = vector.load %arg2[%c0_1, %c0_2] : memref<64x64xbf16, #tpu.memory_space<vmem>>, vector<64x64xbf16>
    %cst = arith.constant dense<0.000000e+00> : vector<8x64xf32>
    %3 = tpu.matmul %1, %2, %cst {dimension_numbers = #tpu.dot_dimension_numbers<[1], [0], [0], [1], [0, 0, 1, 1], [], []>} : vector<8x64xbf16>, vector<64x64xbf16>, vector<8x64xf32> -> vector<8x64xf32>
    %c0_3 = arith.constant 0 : index
    %c0_4 = arith.constant 0 : index
    %4 = vector.load %arg3[%c0_3, %c0_4] : memref<1x64xf32, #tpu.memory_space<vmem>>, vector<1x64xf32>
    %5 = vector.broadcast %4 : vector<1x64xf32> to vector<8x64xf32>
    %6 = arith.addf %3, %5 : vector<8x64xf32>
    %7 = arith.negf %6 : vector<8x64xf32>
    %8 = math.exp %7 : vector<8x64xf32>
    %cst_5 = arith.constant 1.000000e+00 : f32
    %9 = vector.broadcast %cst_5 : f32 to vector<8x64xf32>
    %10 = arith.addf %9, %8 : vector<8x64xf32>
    %11 = arith.divf %9, %10 : vector<8x64xf32>
    %12 = arith.truncf %11 : vector<8x64xf32> to vector<8x64xbf16>
    %c0_6 = arith.constant 0 : index
    %c0_7 = arith.constant 0 : index
    %13 = vector.load %arg4[%c0_6, %c0_7] : memref<64x128xbf16, #tpu.memory_space<vmem>>, vector<64x128xbf16>
    %cst_8 = arith.constant dense<0.000000e+00> : vector<8x128xf32>
    %14 = tpu.matmul %12, %13, %cst_8 {dimension_numbers = #tpu.dot_dimension_numbers<[1], [0], [0], [1], [0, 0, 1, 1], [], []>} : vector<8x64xbf16>, vector<64x128xbf16>, vector<8x128xf32> -> vector<8x128xf32>
    %c0_9 = arith.constant 0 : index
    %c0_10 = arith.constant 0 : index
    %15 = vector.load %arg5[%c0_9, %c0_10] : memref<1x128xf32, #tpu.memory_space<vmem>>, vector<1x128xf32>
    %16 = vector.broadcast %15 : vector<1x128xf32> to vector<8x128xf32>
    %17 = arith.addf %14, %16 : vector<8x128xf32>
    %cst_11 = arith.constant dense<0xFF800000> : vector<8xf32>
    %18 = vector.multi_reduction <maximumf>, %17, %cst_11 [1] : vector<8x128xf32> to vector<8xf32>
    %19 = vector.shape_cast %18 : vector<8xf32> to vector<8x1xf32>
    %20 = vector.broadcast %19 : vector<8x1xf32> to vector<8x128xf32>
    %21 = arith.subf %17, %20 : vector<8x128xf32>
    %22 = math.exp %21 : vector<8x128xf32>
    %cst_12 = arith.constant dense<0.000000e+00> : vector<8xf32>
    %23 = vector.multi_reduction <add>, %22, %cst_12 [1] : vector<8x128xf32> to vector<8xf32>
    %24 = vector.shape_cast %23 : vector<8xf32> to vector<8x1xf32>
    %25 = vector.broadcast %24 : vector<8x1xf32> to vector<8x128xf32>
    %26 = arith.divf %22, %25 : vector<8x128xf32>
    %c0_13 = arith.constant 0 : index
    %c0_14 = arith.constant 0 : index
    %27 = vector.load %arg6[%c0_13, %c0_14] : memref<8x128xf32, #tpu.memory_space<vmem>>, vector<8x128xf32>
    tpu.vector_store %arg6[%c0_13, %c0_14], %26 {strides = array<i32>} : memref<8x128xf32, #tpu.memory_space<vmem>>, vector<8x128xf32>,
    return
  }
  func.func @transform_0(%arg0: i32) -> (i32, i32) {
    %c0_i32 = arith.constant 0 : i32
    %c0_i32_0 = arith.constant 0 : i32
    return %arg0, %c0_i32 : i32, i32
  }
  func.func @transform_1(%arg0: i32) -> (i32, i32) {
    %c0_i32 = arith.constant 0 : i32
    %c0_i32_0 = arith.constant 0 : i32
    %c0_i32_1 = arith.constant 0 : i32
    return %c0_i32, %c0_i32_0 : i32, i32
  }
  func.func @transform_2(%arg0: i32) -> (i32, i32) {
    %c0_i32 = arith.constant 0 : i32
    %c0_i32_0 = arith.constant 0 : i32
    %c0_i32_1 = arith.constant 0 : i32
    return %c0_i32, %c0_i32_0 : i32, i32
  }
  func.func @transform_3(%arg0: i32) -> (i32, i32) {
    %c0_i32 = arith.constant 0 : i32
    %c0_i32_0 = arith.constant 0 : i32
    %c0_i32_1 = arith.constant 0 : i32
    return %c0_i32, %c0_i32_0 : i32, i32
  }
  func.func @transform_4(%arg0: i32) -> (i32, i32) {
    %c0_i32 = arith.constant 0 : i32
    %c0_i32_0 = arith.constant 0 : i32
    %c0_i32_1 = arith.constant 0 : i32
    return %c0_i32, %c0_i32_0 : i32, i32
  }
  func.func @transform_5(%arg0: i32) -> (i32, i32) {
    %c0_i32 = arith.constant 0 : i32
    %c0_i32_0 = arith.constant 0 : i32
    return %arg0, %c0_i32 : i32, i32
  }
}

</mosaic_0001>

<bundles_post_ra>
// kernel: small_classification_forward.1
= control target key start
LH: loop header
LB: loop body
LE: loop exit
PB: predicated region body
PF: predicated region fallthrough
CT: control target
= control target key end

     0   :  { %v274_v0 = vmov 0.0   ;;  %vm275_vm0 = vmmov 0   ;;  %vm62_vm1 = vcmask 523264   ;;  %s344_s1 = inlined_call_operand.vmem [shape: bf16[64,64], index: 1, kind: input, shape index: {}]   ;;  %s345_s0 = inlined_call_operand.vmem [shape: f32[8,64], index: 0, kind: input, shape index: {}]   ;;  %s346_s3 = inlined_call_operand.vmem [shape: bf16[64,128], index: 3, kind: input, shape index: {}]   ;;  %s347_s2 = inlined_call_operand.vmem [shape: f32[1,64], index: 2, kind: input, shape index: {}]   ;;  %s348_s4 = inlined_call_operand.vmem [shape: f32[1,128], index: 4, kind: input, shape index: {}]   ;;  %s349_s5 = inlined_call_operand.vmem [shape: f32[8,128], index: 5, kind: output, shape index: {}]  }
   0x1   :  { %232 = vmatprep.subr.bf16.mxu0 %v274_v0  ;;  %v258_v1 = vld [vmem:[%s344_s1] sm:$0xff]   ;;  %240 = vmatprep.mubr.msk.bf16.mxu0 %vm275_vm0, %v274_v0  ;;  %v259_v2 = vld [vmem:[%s344_s1 + $0x8] sm:$0xff]   ;;  %v260_v3 = vld [vmem:[%s344_s1 + $0x10] sm:$0xff]  }
   0x2   :  { %244 = vmatprep.subr.bf16.mxu1 %v274_v0  ;;  %252 = vmatprep.mubr.msk.bf16.mxu1 %vm275_vm0, %v274_v0  ;;  %v261_v4 = vld [vmem:[%s344_s1 + $0x18] sm:$0xff]   ;;  %v21_v5 = vld [vmem:[%s345_s0] sm:$0xff]  ;;  %v263_v8 = vld [vmem:[%s346_s3 + $0x8] sm:$0xff]  }
   0x3   :  { %233 = vmatpush3.bf16.msra.mxu0 %v258_v1  ;;  %v22_v6 = vpack.c.bf16 %v21_v5, %v21_v5  ;;  %v262_v7 = vld [vmem:[%s346_s3] sm:$0xff]   ;;  %v264_v9 = vld [vmem:[%s346_s3 + $0x10] sm:$0xff]   ;;  %v265_v10 = vld [vmem:[%s346_s3 + $0x18] sm:$0xff]  }
   0x4   :  { %234 = vmatprep.subr.bf16.mxu0 %v274_v0  ;;  %245 = vmatpush3.bf16.msra.mxu1 %v262_v7  ;;  %v209_v11 = vld [vmem:[%s347_s2] ss:$0 sm:$0xff] }
   0x5   :  { %246 = vmatprep.subr.bf16.mxu1 %v274_v0  ;;  %v216_v22 = vld [vmem:[%s348_s4] ss:$0 sm:$0xff] }
   0x7   :  { %235 = vmatpush3.bf16.msra.mxu0 %v259_v2 }
   0x8   :  { %236 = vmatprep.subr.bf16.mxu0 %v274_v0  ;;  %247 = vmatpush3.bf16.msra.mxu1 %v263_v8 }
   0x9   :  { %248 = vmatprep.subr.bf16.mxu1 %v274_v0 }
   0xb   :  { %237 = vmatpush3.bf16.msra.mxu0 %v260_v3 }
   0xc   :  { %238 = vmatprep.subr.bf16.mxu0 %v274_v0  ;;  %249 = vmatpush3.bf16.msra.mxu1 %v264_v9 }
   0xd   :  { %250 = vmatprep.subr.bf16.mxu1 %v274_v0 }
   0xf   :  { %239 = vmatpush3.bf16.msra.mxu0 %v261_v4 }
  0x10   :  { %251 = vmatpush3.bf16.msra.mxu1 %v265_v10 }
  0x12   :  { %241 = vmatmul.mubr.msk.bf16.vlgmr.msra.gmra.mrb[0].mxu0 %vm62_vm1, %v22_v6 }
  0xe5   :  { %v100_v12 = vpop.f32.mrb[0].mxu0 }
  0xe6   :  { %v101_v13 = vadd.f32 %v209_v11, %v100_v12  ;;  %v242_v14 = vpop.f32.mrb[1].mxu0 }
  0xe7   :  { %v103_v15 = vpop.f32.mrb[2].mxu0 }
  0xe8   :  { %v215_v16 = vmul.f32 -1.442695, %v101_v13  ;;  %v243_v17 = vpop.f32.mrb[3].mxu0 }
  0xea   :  { %266 = vpow2.f32 %v215_v16 }
  0xf4   :  { %v267_v18 = vpop.eup %266 }
  0xf5   :  { %v109_v19 = vadd.f32 1.0, %v267_v18 }
  0xf7   :  { %268 = vrcp.f32 %v109_v19 }
 0x101   :  { %v269_v20 = vpop.eup %268 }
 0x102   :  { %v112_v21 = vpack.c.bf16 %v269_v20, %v269_v20 }
 0x104   :  { %253 = vmatmul.mubr.msk.bf16.vlgmr.msra.gmra.mrb[0].mxu1 %vm62_vm1, %v112_v21 }
 0x1d7   :  { %v189_v23 = vpop.f32.mrb[0].mxu1 }
 0x1d8   :  { %v190_v24 = vadd.f32 %v216_v22, %v189_v23  ;;  %v254_v25 = vpop.f32.mrb[1].mxu1 }
 0x1d9   :  { %v192_v26 = vpop.f32.mrb[2].mxu1 }
 0x1da   :  { %195 = vmax.xlane.f32.xlu0 %v190_v24  ;;  %v255_v27 = vpop.f32.mrb[3].mxu1 }
 0x267   :  { %v196_v28 = vpop.xlane.xlu0 %195 }
 0x268   :  { %v197_v29 = vsub.f32 %v190_v24, %v196_v28 }
 0x26a   :  { %v198_v30 = vmul.f32 1.442695, %v197_v29 }
 0x26c   :  { %270 = vpow2.f32 %v198_v30 }
 0x276   :  { %v271_v31 = vpop.eup %270 }
 0x277   :  { %200 = vadd.xlane.f32.xlu0 %v271_v31 }
 0x304   :  { %v201_v32 = vpop.xlane.xlu0 %200 }
 0x305   :  { %272 = vrcp.f32 %v201_v32 }
 0x30f   :  { %v273_v33 = vpop.eup %272 }
 0x310   :  { %v203_v34 = vmul.f32 %v273_v33, %v271_v31 }
 0x312   :  { %204 = vst [vmem:[%s349_s5] sm:$0xff] %v203_v34 }

</bundles_post_ra>
